<compile_context>
chip_gen: v7x
topology: tpu7x:2x2x1
jax: 0.10.0
libtpu: 0.0.40
codegen_flags: <defaults>
</compile_context>

<pallas_src>
import functools

import jax
import jax.numpy as jnp
from jax.experimental import pallas as pl
from jax.experimental.pallas import tpu as pltpu

TEMPERATURE = 0.1
_PAD_LABEL = -(2 ** 31)      # sentinel label for padded rows (never a real label)
_NEG_SENTINEL = -1e30        # finite "-inf" for the masked negative max


def _round_up(x, m):
    return ((x + m - 1) // m) * m


def _vmem_capacity_bytes():
    """Per-TensorCore VMEM capacity; conservative fallback if the query fails."""
    try:
        info = pltpu.get_tpu_info()
        cap = getattr(info, "vmem_capacity_bytes", None)
        if cap:
            return int(cap)
    except Exception:
        pass
    return 64 << 20          # v7x per-core size; safe lower bound everywhere


def _normalize_kernel(e_ref, en_ref, *, scale):
    """L2-normalize a (blk, Dp) row block, fold sqrt(1/T) in, cast to MXU dtype."""
    e = e_ref[...]
    inv = jax.lax.rsqrt(jnp.sum(e * e, axis=-1, keepdims=True)) * scale
    en_ref[...] = (e * inv).astype(en_ref.dtype)


def _ntxent_tile_kernel(cnt_ref, fidx_ref, enq_ref, enk_ref, labr_ref, labc_ref,
                        pos_loss_ref, m_ref, s_ref):
    del fidx_ref                      # consumed only by the index_maps (DMA dedup)
    i = pl.program_id(0)              # anchor (row) block  -- "parallel"
    p = pl.program_id(1)              # phase: 0 = negative-LSE pass, 1 = positive pass
    c = pl.program_id(2)              # candidate (column) block
    nc = pl.num_programs(2)

    @pl.when(jnp.logical_and(p == 0, c == 0))
    def _init():
        m_ref[...] = jnp.full_like(m_ref, _NEG_SENTINEL)
        s_ref[...] = jnp.zeros_like(s_ref)
        pos_loss_ref[...] = jnp.zeros_like(pos_loss_ref)

    def _sim():
        # Cosine-similarity tile scaled by 1/T (folded into both bf16 operands),
        # f32 accumulation, contraction on the last dims (no transposed copy).
        return jax.lax.dot_general(
            enq_ref[...], enk_ref[...],
            dimension_numbers=(((1,), (1,)), ((), ())),
            preferred_element_type=jnp.float32)              # (blk, blk) f32

    @pl.when(p == 0)
    def _neg_pass():                  # online logsumexp over each anchor's negatives
        sim = _sim()
        lab_r = labr_ref[...]                                # (blk, 1) int32
        lab_c = labc_ref[...]                                # (1, blk) int32
        neg = jnp.logical_and(lab_r != lab_c, lab_c != _PAD_LABEL)
        neg_logits = jnp.where(neg, sim, _NEG_SENTINEL)
        blk_max = jnp.max(neg_logits, axis=1, keepdims=True)
        m_old = m_ref[...]
        m_new = jnp.maximum(m_old, blk_max)
        # Masked entries: exp(-1e30 - m_new) underflows to 0 whenever m_new holds
        # a real logit; if m_new is still the sentinel (anchor saw no negative
        # yet) the spurious contribution is wiped by exp(m_old - m_new) later or
        # dominated by the sentinel in the finalized LSE -> no where/minimum.
        contrib = jnp.sum(jnp.exp(neg_logits - m_new), axis=1, keepdims=True)
        s_ref[...] = s_ref[...] * jnp.exp(m_old - m_new) + contrib
        m_ref[...] = m_new

        @pl.when(c == nc - 1)
        def _finalize():              # per-anchor negative LSE, once per row block
            s_ref[...] = m_ref[...] + jnp.log(s_ref[...])

    # Scalar-prefetched per-tile positive count gates the whole positive pass.
    has_pos = cnt_ref[i * nc + c] > 0

    @pl.when(jnp.logical_and(p == 1, has_pos))
    def _pos_pass():                  # positives use the finalized negative LSE
        sim = _sim()
        x = s_ref[...] - sim                                  # lse_neg - s_ap
        # stabilized softplus: log(1 + exp(x)) without f32 overflow for large x;
        # x == -inf / -1e30 (anchor without negatives) cleanly yields 0.
        per_pair = jnp.maximum(x, 0.0) + jnp.log(1.0 + jnp.exp(-jnp.abs(x)))
        lab_r = labr_ref[...]
        pos = jnp.logical_and(lab_r == labc_ref[...], lab_r != _PAD_LABEL)

        def _accumulate(mask):
            pos_loss_ref[...] += jnp.sum(
                jnp.where(mask, per_pair, 0.0), axis=1, keepdims=True)

        is_diag = i == c              # square aligned tiles: only diagonal tiles
                                      # can contain self pairs
        @pl.when(is_diag)
        def _():
            ridx = jax.lax.broadcasted_iota(jnp.int32, sim.shape, 0)
            cidx = jax.lax.broadcasted_iota(jnp.int32, sim.shape, 1)
            _accumulate(jnp.logical_and(pos, ridx != cidx))

        @pl.when(jnp.logical_not(is_diag))
        def _():
            _accumulate(pos)


def ntxent_loss_pallas(embs, word_labels, negatives=None, negatives2=None,
                       temperature=TEMPERATURE, block=256,
                       mxu_dtype=jnp.bfloat16):
    """Pallas equivalent of Loss(temperature).forward(embs, negatives,
    negatives2, word_labels) on the active ('ntx') code path.
    `negatives` / `negatives2` are unused on that path."""
    del negatives, negatives2
    n, d = embs.shape

    # Lane-dense layout: zero-pad the embedding dim to a multiple of 128.
    dp = _round_up(d, 128)
    # Square tiles, multiple of 8 sublanes; 256 is MXU-friendly on v5e/v6e/v7x.
    blk = int(min(block, _round_up(n, 8)))
    np_ = _round_up(n, blk)
    if np_ // blk > 1 and blk % 128 != 0:     # multi-block grids need lane-aligned tiles
        blk = _round_up(blk, 128)
        np_ = _round_up(n, blk)
    nblk = np_ // blk

    e = embs.astype(jnp.float32)
    e = jnp.pad(e, ((0, 0), (0, dp - d)))
    # Padded rows are constant 1.0 so they normalize cleanly (no inf/nan);
    # they are excluded from positives/negatives via the sentinel label.
    e = jnp.pad(e, ((0, np_ - n), (0, 0)), constant_values=1.0)

    lab = word_labels.astype(jnp.int32).reshape(-1)
    lab = jnp.pad(lab, (0, np_ - n), constant_values=_PAD_LABEL)
    lab_row = lab.reshape(np_, 1)
    lab_col = lab.reshape(1, np_)

    # ---- label-only metadata (plain JAX, no similarities) ----
    # Per-tile positive counts gate the kernel's positive pass; the total count
    # is the mean denominator. O(N^2) bool work, cheap next to the O(N^2 D) kernel.
    same_full = jnp.logical_and(lab[:, None] == lab[None, :],
                                lab[:, None] != _PAD_LABEL)
    pos_full = jnp.logical_and(same_full, jnp.logical_not(jnp.eye(np_, dtype=bool)))
    tile_cnt2d = pos_full.reshape(nblk, blk, nblk, blk).sum(axis=(1, 3)).astype(jnp.int32)
    pos_count = jnp.sum(tile_cnt2d).astype(jnp.float32)
    tile_cnt = tile_cnt2d.reshape(-1)                         # (nblk*nblk,)

    # Phase-1 candidate-block fetch schedule ("dedup" trick): for tiles without
    # positives return the previously fetched block index so the enk DMA is
    # skipped along with the compute.
    cols = jnp.arange(nblk, dtype=jnp.int32)
    last_pos = jax.lax.cummax(jnp.where(tile_cnt2d > 0, cols[None, :], -1), axis=1)
    fetch_p1 = jnp.where(last_pos < 0, nblk - 1, last_pos).astype(jnp.int32)
    fetch_p0 = jnp.broadcast_to(cols[None, :], (nblk, nblk)).astype(jnp.int32)
    fetch_idx = jnp.stack([fetch_p0, fetch_p1], axis=1).reshape(-1)  # (nblk*2*nblk,)

    # --- prologue: normalize once, fold sqrt(1/T), bf16 output (parallel rows) ---
    scale = float(1.0 / float(temperature)) ** 0.5
    en = pl.pallas_call(
        functools.partial(_normalize_kernel, scale=scale),
        out_shape=jax.ShapeDtypeStruct((np_, dp), mxu_dtype),
        grid_spec=pltpu.PrefetchScalarGridSpec(
            num_scalar_prefetch=0,
            grid=(nblk,),
            in_specs=[pl.BlockSpec((blk, dp), lambda i: (i, 0))],
            out_specs=pl.BlockSpec((blk, dp), lambda i: (i, 0))),
        compiler_params=pltpu.CompilerParams(
            dimension_semantics=("parallel",)),
    )(e)

    # --- main: tiled two-pass kernel ---
    # VMEM budget: double-buffered bf16 en blocks plus (blk, blk) f32 temporaries;
    # capped at half the per-core capacity (32 MiB on v7x, 48 MiB on v5e/v6e).
    est = 2 * 2 * (blk * dp * 2) + 16 * blk * blk * 4 + (1 << 20)
    vmem_limit = int(min(max(2 * est, 4 << 20), _vmem_capacity_bytes() // 2, 48 << 20))

    pos_loss = pl.pallas_call(
        _ntxent_tile_kernel,
        out_shape=jax.ShapeDtypeStruct((np_, 1), jnp.float32),
        grid_spec=pltpu.PrefetchScalarGridSpec(
            num_scalar_prefetch=2,                  # tile_cnt, fetch_idx -> SMEM
            grid=(nblk, 2, nblk),                   # (row block, phase, col block)
            in_specs=[
                pl.BlockSpec((blk, dp), lambda i, p, c, cnt, fidx: (i, 0)),   # anchors
                pl.BlockSpec((blk, dp),                                       # candidates
                             lambda i, p, c, cnt, fidx:
                                 (fidx[(i * 2 + p) * nblk + c], 0)),
                pl.BlockSpec((blk, 1), lambda i, p, c, cnt, fidx: (i, 0)),    # labels (rows)
                pl.BlockSpec((1, blk), lambda i, p, c, cnt, fidx: (0, c)),    # labels (cols)
            ],
            out_specs=pl.BlockSpec((blk, 1), lambda i, p, c, cnt, fidx: (i, 0)),
            scratch_shapes=[pltpu.VMEM((blk, 1), jnp.float32),   # running neg max
                            pltpu.VMEM((blk, 1), jnp.float32)]), # running neg sum -> LSE
        compiler_params=pltpu.CompilerParams(
            dimension_semantics=("parallel", "arbitrary", "arbitrary"),
            vmem_limit_bytes=vmem_limit),
    )(tile_cnt, fetch_idx, en, en, lab_row, lab_col)

    total = jnp.sum(pos_loss)
    # NTXentLoss averages over positive pairs; guard the degenerate no-positive case.
    return total / jnp.maximum(pos_count, 1.0)


def ntxent_loss_ref(embs, word_labels, temperature=TEMPERATURE,
                    matmul_dtype=jnp.float32):
    """Pure-JAX reference for the NTXentLoss semantics (for verification)."""
    e = embs.astype(jnp.float32)
    scale = float(1.0 / float(temperature)) ** 0.5
    en = e * (jax.lax.rsqrt(jnp.sum(e * e, axis=1, keepdims=True)) * scale)
    en = en.astype(matmul_dtype)
    sim = jnp.dot(en, en.T, preferred_element_type=jnp.float32).astype(jnp.float32)
    labels = word_labels.reshape(-1)
    same = labels[:, None] == labels[None, :]
    eye = jnp.eye(labels.shape[0], dtype=bool)
    pos_mask = same & ~eye
    neg_mask = ~same
    neg_logits = jnp.where(neg_mask, sim, -jnp.inf)
    row_neg_lse = jax.nn.logsumexp(neg_logits, axis=1, keepdims=True)   # (N, 1)
    per_pair = jnp.logaddexp(sim, row_neg_lse) - sim
    return jnp.sum(jnp.where(pos_mask, per_pair, 0.0)) / jnp.sum(pos_mask)


if __name__ == "__main__":
    key = jax.random.PRNGKey(0)
    k1, k2 = jax.random.split(key)

    # Small shape consistent with the module: batch_size=4 -> 8 embeddings, dim 32,
    # paired labels (first half and second half share labels).
    N, D = 8, 32
    embs = jax.random.normal(k1, (N, D), dtype=jnp.float32)
    word_labels = jnp.array([0, 1, 2, 3, 0, 1, 2, 3], dtype=jnp.int32)

    loss = jax.block_until_ready(ntxent_loss_pallas(embs, word_labels))
    ref_same = jax.block_until_ready(
        ntxent_loss_ref(embs, word_labels, matmul_dtype=jnp.bfloat16))
    ref_f32 = jax.block_until_ready(ntxent_loss_ref(embs, word_labels))
    assert bool(jnp.isfinite(loss)), loss
    assert jnp.allclose(loss, ref_same, rtol=1e-2, atol=1e-2), (loss, ref_same)
    assert jnp.allclose(loss, ref_f32, rtol=5e-2, atol=5e-2), (loss, ref_f32)

    # Multi-block case: exercises the tiled grid, the phase-1 tile skip and the
    # candidate-block DMA dedup (positives live only in off-diagonal tiles here).
    N2, D2 = 512, 64
    embs2 = jax.random.normal(k2, (N2, D2), dtype=jnp.float32)
    labels2 = jnp.concatenate(
        [jnp.arange(N2 // 2, dtype=jnp.int32), jnp.arange(N2 // 2, dtype=jnp.int32)])
    loss2 = jax.block_until_ready(ntxent_loss_pallas(embs2, labels2))
    ref2_same = jax.block_until_ready(
        ntxent_loss_ref(embs2, labels2, matmul_dtype=jnp.bfloat16))
    ref2_f32 = jax.block_until_ready(ntxent_loss_ref(embs2, labels2))
    assert bool(jnp.isfinite(loss2)), loss2
    assert jnp.allclose(loss2, ref2_same, rtol=1e-2, atol=1e-2), (loss2, ref2_same)
    assert jnp.allclose(loss2, ref2_f32, rtol=5e-2, atol=5e-2), (loss2, ref2_f32)

    print("KERNEL_OK")
</pallas_src>

<mosaic_0001>
module attributes {stable_mosaic.version = 11 : i64} {
  func.func @_normalize_kernel(%arg0: i32, %arg1: memref<8x128xf32, #tpu.memory_space<vmem>>, %arg2: memref<8x128xbf16, #tpu.memory_space<vmem>>) attributes {dimension_semantics = [#tpu.dimension_semantics<parallel>], iteration_bounds = array<i64: 1>, scalar_prefetch = 0 : i64, scratch_operands = 0 : i64, tpu.core_type = #tpu.core_type<tc>, window_params = [{transform_indices = @transform_0, window_bounds = array<i64: 8, 128>}, {transform_indices = @transform_1, window_bounds = array<i64: 8, 128>}]} {
    %c0 = arith.constant 0 : index
    %c0_0 = arith.constant 0 : index
    %0 = vector.load %arg1[%c0, %c0_0] : memref<8x128xf32, #tpu.memory_space<vmem>>, vector<8x128xf32>
    %1 = arith.mulf %0, %0 : vector<8x128xf32>
    %cst = arith.constant dense<0.000000e+00> : vector<8xf32>
    %2 = vector.multi_reduction <add>, %1, %cst [1] : vector<8x128xf32> to vector<8xf32>
    %3 = vector.shape_cast %2 : vector<8xf32> to vector<8x1xf32>
    %4 = math.rsqrt %3 : vector<8x1xf32>
    %cst_1 = arith.constant 3.1622777 : f32
    %5 = vector.broadcast %cst_1 : f32 to vector<8x1xf32>
    %6 = arith.mulf %4, %5 : vector<8x1xf32>
    %7 = vector.broadcast %6 : vector<8x1xf32> to vector<8x128xf32>
    %8 = arith.mulf %0, %7 : vector<8x128xf32>
    %9 = arith.truncf %8 : vector<8x128xf32> to vector<8x128xbf16>
    %c0_2 = arith.constant 0 : index
    %c0_3 = arith.constant 0 : index
    %10 = vector.load %arg2[%c0_2, %c0_3] : memref<8x128xbf16, #tpu.memory_space<vmem>>, vector<8x128xbf16>
    tpu.vector_store %arg2[%c0_2, %c0_3], %9 {strides = array<i32>} : memref<8x128xbf16, #tpu.memory_space<vmem>>, vector<8x128xbf16>,
    return
  }
  func.func @transform_0(%arg0: i32) -> (i32, i32) {
    %c0_i32 = arith.constant 0 : i32
    %c0_i32_0 = arith.constant 0 : i32
    return %arg0, %c0_i32 : i32, i32
  }
  func.func @transform_1(%arg0: i32) -> (i32, i32) {
    %c0_i32 = arith.constant 0 : i32
    %c0_i32_0 = arith.constant 0 : i32
    return %arg0, %c0_i32 : i32, i32
  }
}

</mosaic_0001>

<bundles_post_ra>
// kernel: tpu_custom_call.1
= control target key start
LH: loop header
LB: loop body
LE: loop exit
PB: predicated region body
PF: predicated region fallthrough
CT: control target
= control target key end

     0   :  { %6 = vsyncpa [#allocation3], 0  ;;  %s133_s0 = inlined_call_operand.hbm [shape: f32[8,128], index: 0, kind: input, shape index: {}]   ;;  %s134_s1 = inlined_call_operand.hbm [shape: bf16[8,128], index: 1, kind: output, shape index: {}]  }
   0x1   :  { %7 = vsyncpa [#allocation4], 0  ;;  %s97_s6 = smov [#allocation2]   ;;  %s49_s10 = scalar_lea.hbm %s133_s0, 128 }
   0x2   :  { %s14_s7 = sshll.u32 %s97_s6, 4  ;;  %p50_p0 = scmp.ne.s32.totalorder %s133_s0, %s49_s10  ;;  %s15_s7 = int_to_ptr.vmem [resolvable:$true] %s14_s7 }
   0x3   :  { %p53_p1 = scmp.lt.u32.totalorder %s49_s10, %s133_s0 }
   0x5   :  { %p55_p2 = pnand %p53_p1, %p50_p0 }
   0x7   :  { %58 = shalt.err (!%p55_p2)
}
   0x8   :  { %s59_s15 = scalar_lea.vmem %s15_s7, 128  ;;  %p64_p4 = scmp.lt.s32.totalorder %s15_s7, %s15_s7 }
   0x9   :  { %p60_p3 = scmp.ne.s32.totalorder %s15_s7, %s59_s15  ;;  %p65_p5 = scmp.lt.s32.totalorder %s59_s15, %s59_s15 }
   0xb   :  { %p66_p6 = por %p65_p5, %p64_p4 }
   0xd   :  { %p67_p7 = pnand %p66_p6, %p60_p3 }
   0xf   :  { %70 = shalt.err (!%p67_p7)
}
  0x10   :  { %17 = dma.hbm_to_vmem [thread:$0]  %s133_s0, 128, %s15_s7, [#allocation3]  }
  0x11   :  { %93 = dma.done.wait [#allocation3], 128  }
  0x12   :  { %94 = vsyncadd [#allocation3], 4294967168  ;;  %v21_v0 = vld [vmem:[#allocation2] sm:$0xff]  ;;  %s98_s18 = smov [#allocation5]  }
  0x13   :  { %v22_v1 = vmul.f32 %v21_v0, %v21_v0  ;;  %s36_s19 = sshll.u32 %s98_s18, 4  ;;  %s37_s19 = int_to_ptr.vmem [resolvable:$true] %s36_s19 }
  0x14   :  { %s71_s20 = scalar_lea.vmem %s37_s19, 64  ;;  %p76_p9 = scmp.lt.s32.totalorder %s37_s19, %s37_s19 }
  0x15   :  { %23 = vadd.xlane.f32.xlu0 %v22_v1  ;;  %p72_p8 = scmp.ne.s32.totalorder %s37_s19, %s71_s20  ;;  %p77_p10 = scmp.lt.s32.totalorder %s71_s20, %s71_s20 }
  0x17   :  { %p78_p11 = por %p77_p10, %p76_p9 }
  0x19   :  { %p79_p12 = pnand %p78_p11, %p72_p8 }
  0xa2   :  { %v24_v2 = vpop.xlane.xlu0 %23 }
  0xa3   :  { %47 = vrsqrt.f32 %v24_v2 }
  0xad   :  { %v48_v3 = vpop.eup %47 }
  0xae   :  { %v26_v4 = vmul.f32 3.1622777, %v48_v3 }
  0xb0   :  { %v27_v5 = vmul.f32 %v26_v4, %v21_v0 }
  0xb2   :  { %v28_v6 = vpack.c.bf16 %v27_v5, %v27_v5 }
  0xb4   :  { %29 = vst [vmem:[#allocation5] sm:$0xf] %v28_v6 }
  0xb5   :  { %82 = shalt.err (!%p79_p12)
}
  0xb6   :  { %s83_s22 = scalar_lea.hbm %s134_s1, 64 }
  0xb7   :  { %p84_p13 = scmp.ne.s32.totalorder %s134_s1, %s83_s22  ;;  %p87_p0 = scmp.lt.u32.totalorder %s83_s22, %s134_s1 }
  0xb9   :  { %p89_p1 = pnand %p87_p0, %p84_p13 }
  0xbb   :  { %92 = shalt.err (!%p89_p1)
}
  0xbc   :  { %39 = dma.vmem_to_hbm [thread:$0]  %s37_s19, 64, %s134_s1, [#allocation4]  }
  0xbd   :  { %95 = dma.done.wait [#allocation4], 64  }
  0xbe   :  { %96 = vsyncadd [#allocation4], 4294967232 }
  0xbf   :  { %43 = vsyncpa [#allocation3], 1 }
  0xc0   :  { %44 = vsyncpa [#allocation4], 1 }

</bundles_post_ra>
